<compile_context>
chip_gen: v6e
topology: v6e:2x2x1
jax: 0.10.0
libtpu: 0.0.40
codegen_flags: <defaults>
</compile_context>

<pallas_src>
import math

import jax
import jax.numpy as jnp
from jax.experimental import pallas as pl
from jax.experimental.pallas import tpu as pltpu

# ---- config (small, consistent with the module) ----
BATCH = 2
SEQ = 8                        # sequence length of hidden_states
HIDDEN = 32                    # config.hidden_size
OUT_DIM = 2                    # ce_pooler final Linear output features
OUT_PAD = 128                  # lane-dense padded output width (multiple of 128)
WEIGHT_DTYPE = jnp.bfloat16    # weight storage/DMA dtype (f32 accumulation preserved)


def _pooler_kernel(x_ref, w1_ref, w2_ref, bias_ref, out_ref):
    """Fused Linear(H,H) -> Tanh -> Linear(H,OUT_PAD) on the first-token slab.

    x_ref   : (B, H)        f32   first-token activations
    w1_ref  : (H, H)        bf16  ce_pooler[0].weight^T
    w2_ref  : (H, OUT_PAD)  bf16  ce_pooler[2].weight^T, zero-padded 2 -> 128 cols
    bias_ref: (2, >=128)    f32   row 0 = b1 (first H cols), row 1 = b2 (first 2 cols)
    out_ref : (B, OUT_PAD)  f32   lane-dense output slab (cols >= OUT_DIM are zero)
    """
    h_dim = w1_ref.shape[0]
    w1 = w1_ref[...]
    w2 = w2_ref[...]
    b1 = bias_ref[0:1, :h_dim]                 # (1, H)       static slice, bcast over batch
    b2 = bias_ref[1:2, :out_ref.shape[1]]      # (1, OUT_PAD)

    # Linear(H, H) + bias + Tanh.  MXU runs bf16 x bf16 -> f32 accumulate; the bias
    # add and tanh stay f32 on the VPU/EUP (also correct for v5e: no bf16 VPU there).
    x = x_ref[...].astype(w1.dtype)
    h = jnp.dot(x, w1, preferred_element_type=jnp.float32) + b1        # (B, H) f32
    h = jnp.tanh(h)

    # Linear(H, 2), computed against the 128-lane padded weight so the store below
    # is lane-dense; the padded columns ride the otherwise-idle MXU for free.
    out = jnp.dot(h.astype(w2.dtype), w2,
                  preferred_element_type=jnp.float32) + b2             # (B, OUT_PAD) f32
    out_ref[...] = out.astype(out_ref.dtype)


def prepare_params(params, weight_dtype=WEIGHT_DTYPE):
    """One-time packing of PyTorch-layout parameters into kernel-friendly layouts.

    Run once at model-load time (NOT per forward call): pads the (H, 2) second Linear
    to (H, OUT_PAD) lanes, packs both biases into a single (2, max(H, OUT_PAD)) f32
    slab, and stores both weight matrices in `weight_dtype` (bf16 halves weight DMA).
    """
    h = params["w1"].shape[0]
    bias_w = max(h, OUT_PAD)

    w2_pad = jnp.zeros((h, OUT_PAD), weight_dtype)
    w2_pad = w2_pad.at[:, :OUT_DIM].set(params["w2"].astype(weight_dtype))

    biases = jnp.zeros((2, bias_w), jnp.float32)
    biases = biases.at[0, :h].set(params["b1"].astype(jnp.float32))
    biases = biases.at[1, :OUT_DIM].set(params["b2"].astype(jnp.float32))

    return {
        "w1": params["w1"].astype(weight_dtype),   # (H, H)
        "w2_pad": w2_pad,                          # (H, OUT_PAD)
        "biases": biases,                          # (2, max(H, OUT_PAD))
    }


def lxmert_pooler(hidden_states, packed_params):
    """hidden_states: (B, S, H) f32.  packed_params: output of prepare_params().

    Returns the ce_pooler logits, shape (B, 2).
    """
    b, _, _ = hidden_states.shape

    # Only the first token enters the kernel: B*H elements DMA'd instead of B*S*H,
    # and no in-kernel sublane gather.  This slice is tiny and fuses with the
    # producer of hidden_states under XLA.
    first_token = hidden_states[:, 0, :]                         # (B, H)

    out_padded = pl.pallas_call(
        _pooler_kernel,
        out_shape=jax.ShapeDtypeStruct((b, OUT_PAD), jnp.float32),
        # No grid: single invocation, whole-array single-buffered VMEM blocks ->
        # minimal prologue, no pointless double-buffering.
        in_specs=[
            pl.BlockSpec(memory_space=pltpu.MemorySpace.VMEM),   # first token (B, H)
            pl.BlockSpec(memory_space=pltpu.MemorySpace.VMEM),   # w1 (H, H) bf16
            pl.BlockSpec(memory_space=pltpu.MemorySpace.VMEM),   # w2 padded (H, 128) bf16
            pl.BlockSpec(memory_space=pltpu.MemorySpace.VMEM),   # bias slab (2, 128) f32
        ],
        out_specs=pl.BlockSpec(memory_space=pltpu.MemorySpace.VMEM),
    )(first_token, packed_params["w1"], packed_params["w2_pad"],
      packed_params["biases"])

    # TODO(synk): in a fused serving graph, return the (B, OUT_PAD) slab and let the
    # consumer slice, saving this extra HBM round-trip.
    return out_padded[:, :OUT_DIM]                               # (B, 2)


# ---------------------------- references (pure JAX) ----------------------------

def _reference_f32(hidden_states, params):
    """Pure-f32 reference mirroring LxmertPooler.forward (ce_pooler branch)."""
    x = hidden_states[:, 0]
    h = jnp.tanh(x @ params["w1"] + params["b1"])
    return h @ params["w2"] + params["b2"]


def _reference_packed(hidden_states, params, weight_dtype=WEIGHT_DTYPE):
    """Reference using the same weight rounding / accumulation dtypes as the kernel."""
    x = hidden_states[:, 0]
    w1 = params["w1"].astype(weight_dtype)
    w2 = params["w2"].astype(weight_dtype)
    h = jnp.dot(x.astype(weight_dtype), w1,
                preferred_element_type=jnp.float32) + params["b1"]
    h = jnp.tanh(h)
    return jnp.dot(h.astype(weight_dtype), w2,
                   preferred_element_type=jnp.float32) + params["b2"]


if __name__ == "__main__":
    key = jax.random.PRNGKey(0)
    keys = jax.random.split(key, 5)

    def init_w(k, shape, fan_in):
        bound = 1.0 / math.sqrt(fan_in)
        return jax.random.uniform(k, shape, jnp.float32, -bound, bound)

    # Weights stored as (in_features, out_features) == PyTorch nn.Linear weight.T
    params = {
        "w1": init_w(keys[0], (HIDDEN, HIDDEN), HIDDEN),
        "b1": init_w(keys[1], (HIDDEN,), HIDDEN),
        "w2": init_w(keys[2], (HIDDEN, OUT_DIM), HIDDEN),
        "b2": init_w(keys[3], (OUT_DIM,), HIDDEN),
    }
    hidden_states = jax.random.normal(keys[4], (BATCH, SEQ, HIDDEN), jnp.float32)

    packed = prepare_params(params)          # one-time param packing (not per call)

    out = lxmert_pooler(hidden_states, packed)
    out = jax.block_until_ready(out)
    assert out.shape == (BATCH, OUT_DIM)

    # Tight check vs a reference that uses the same bf16 weight rounding and f32
    # accumulation as the kernel.
    ref_packed = _reference_packed(hidden_states, params)
    assert jnp.allclose(out, ref_packed, atol=1e-4, rtol=1e-4), "mismatch vs packed reference"

    # Loose check vs the pure-f32 module semantics (bounds the bf16 weight error).
    ref_f32 = _reference_f32(hidden_states, params)
    assert jnp.allclose(out, ref_f32, atol=5e-2, rtol=0.0), "mismatch vs f32 reference"

    print("KERNEL_OK")
</pallas_src>

<mosaic_0001>
module attributes {stable_mosaic.version = 11 : i64} {
  func.func @_pooler_kernel(%arg0: memref<2x32xf32, #tpu.memory_space<vmem>>, %arg1: memref<32x32xbf16, #tpu.memory_space<vmem>>, %arg2: memref<32x128xbf16, #tpu.memory_space<vmem>>, %arg3: memref<2x128xf32, #tpu.memory_space<vmem>>, %arg4: memref<2x128xf32, #tpu.memory_space<vmem>>) attributes {dimension_semantics = [], scalar_prefetch = 0 : i64, scratch_operands = 0 : i64, tpu.core_type = #tpu.core_type<tc>} {
    %c0 = arith.constant 0 : index
    %c0_0 = arith.constant 0 : index
    %0 = vector.load %arg1[%c0, %c0_0] : memref<32x32xbf16, #tpu.memory_space<vmem>>, vector<32x32xbf16>
    %c0_1 = arith.constant 0 : index
    %c0_2 = arith.constant 0 : index
    %1 = vector.load %arg2[%c0_1, %c0_2] : memref<32x128xbf16, #tpu.memory_space<vmem>>, vector<32x128xbf16>
    %c0_3 = arith.constant 0 : index
    %c0_4 = arith.constant 0 : index
    %2 = vector.load %arg3[%c0_3, %c0_4] : memref<2x128xf32, #tpu.memory_space<vmem>>, vector<1x32xf32>
    %c1 = arith.constant 1 : index
    %c0_5 = arith.constant 0 : index
    %3 = vector.load %arg3[%c1, %c0_5] : memref<2x128xf32, #tpu.memory_space<vmem>>, vector<1x128xf32>
    %c0_6 = arith.constant 0 : index
    %c0_7 = arith.constant 0 : index
    %4 = vector.load %arg0[%c0_6, %c0_7] : memref<2x32xf32, #tpu.memory_space<vmem>>, vector<2x32xf32>
    %5 = arith.truncf %4 : vector<2x32xf32> to vector<2x32xbf16>
    %cst = arith.constant dense<0.000000e+00> : vector<2x32xf32>
    %6 = tpu.matmul %5, %0, %cst {dimension_numbers = #tpu.dot_dimension_numbers<[1], [0], [0], [1], [0, 0, 1, 1], [], []>} : vector<2x32xbf16>, vector<32x32xbf16>, vector<2x32xf32> -> vector<2x32xf32>
    %7 = vector.broadcast %2 : vector<1x32xf32> to vector<2x32xf32>
    %8 = arith.addf %6, %7 : vector<2x32xf32>
    %9 = math.tanh %8 : vector<2x32xf32>
    %10 = arith.truncf %9 : vector<2x32xf32> to vector<2x32xbf16>
    %cst_8 = arith.constant dense<0.000000e+00> : vector<2x128xf32>
    %11 = tpu.matmul %10, %1, %cst_8 {dimension_numbers = #tpu.dot_dimension_numbers<[1], [0], [0], [1], [0, 0, 1, 1], [], []>} : vector<2x32xbf16>, vector<32x128xbf16>, vector<2x128xf32> -> vector<2x128xf32>
    %12 = vector.broadcast %3 : vector<1x128xf32> to vector<2x128xf32>
    %13 = arith.addf %11, %12 : vector<2x128xf32>
    %c0_9 = arith.constant 0 : index
    %c0_10 = arith.constant 0 : index
    %14 = vector.load %arg4[%c0_9, %c0_10] : memref<2x128xf32, #tpu.memory_space<vmem>>, vector<2x128xf32>
    tpu.vector_store %arg4[%c0_9, %c0_10], %13 {strides = array<i32>} : memref<2x128xf32, #tpu.memory_space<vmem>>, vector<2x128xf32>,
    return
  }
}

</mosaic_0001>

<bundles_post_ra>
// kernel: tpu_custom_call.1
= control target key start
LH: loop header
LB: loop body
LE: loop exit
PB: predicated region body
PF: predicated region fallthrough
CT: control target
= control target key end

     0   :  { %9 = vsyncpa [#allocation3], 0  ;;  %s391_s0 = inlined_call_operand.hbm [shape: f32[2,32], index: 0, kind: input, shape index: {}]   ;;  %s392_s1 = inlined_call_operand.hbm [shape: bf16[32,32], index: 1, kind: input, shape index: {}]   ;;  %s393_s2 = inlined_call_operand.hbm [shape: bf16[32,128], index: 2, kind: input, shape index: {}]   ;;  %s394_s3 = inlined_call_operand.vmem [shape: f32[2,128], index: 3, kind: input, shape index: {}]   ;;  %s395_s4 = inlined_call_operand.hbm [shape: f32[2,128], index: 4, kind: output, shape index: {}]  }
   0x1   :  { %10 = vsyncpa [#allocation6], 0 }
   0x2   :  { %11 = vsyncpa [#allocation4], 0  ;;  %s338_s15 = smov [#allocation5]  }
   0x3   :  { %s27_s16 = sshll.u32 %s338_s15, 4  ;;  %s28_s16 = int_to_ptr.vmem [resolvable:$true] %s27_s16 }
   0x4   :  { %s260_s17 = scalar_lea.vmem %s28_s16, 256  ;;  %p265_p1 = scmp.lt.s32.totalorder %s28_s16, %s28_s16 }
   0x5   :  { %p261_p0 = scmp.ne.s32.totalorder %s28_s16, %s260_s17  ;;  %p266_p2 = scmp.lt.s32.totalorder %s260_s17, %s260_s17 }
   0x7   :  { %p267_p3 = por %p266_p2, %p265_p1 }
   0x9   :  { %p268_p4 = pnand %p267_p3, %p261_p0 }
   0xb   :  { %271 = shalt.err (!%p268_p4)
}
   0xc   :  { %s339_s18 = smov 64   ;;  %s340_s19 = smov 4  }
   0xd   :  { %33 = dma.hbm_to_vmem [thread:$0]  %s392_s1, 256, %s28_s16, [#allocation6], %s339_s18, %s339_s18, %s340_s19  }
   0xe   :  { %s341_s22 = smov [#allocation2]   ;;  %s342_s24 = smov [#allocation7]  }
   0xf   :  { %s18_s23 = sshll.u32 %s341_s22, 4  ;;  %s39_s25 = sshll.u32 %s342_s24, 4  ;;  %s19_s23 = int_to_ptr.vmem [resolvable:$true] %s18_s23  ;;  %s40_s25 = int_to_ptr.vmem [resolvable:$true] %s39_s25 }
  0x10   :  { %s280_s26 = scalar_lea.vmem %s19_s23, 32  ;;  %p285_p6 = scmp.lt.s32.totalorder %s19_s23, %s19_s23 }
  0x11   :  { %p281_p5 = scmp.ne.s32.totalorder %s19_s23, %s280_s26  ;;  %p286_p7 = scmp.lt.s32.totalorder %s280_s26, %s280_s26 }
  0x13   :  { %p287_p8 = por %p286_p7, %p285_p6 }
  0x15   :  { %p288_p9 = pnand %p287_p8, %p281_p5 }
  0x17   :  { %291 = shalt.err (!%p288_p9)
}
  0x18   :  { %21 = dma.hbm_to_vmem [thread:$0]  %s391_s0, 32, %s19_s23, [#allocation3]  }
  0x19   :  { %s300_s29 = scalar_lea.vmem %s40_s25, 256  ;;  %p305_p11 = scmp.lt.s32.totalorder %s40_s25, %s40_s25 }
  0x1a   :  { %p301_p10 = scmp.ne.s32.totalorder %s40_s25, %s300_s29  ;;  %p306_p12 = scmp.lt.s32.totalorder %s300_s29, %s300_s29 }
  0x1c   :  { %p307_p13 = por %p306_p12, %p305_p11 }
  0x1e   :  { %p308_p0 = pnand %p307_p13, %p301_p10 }
  0x20   :  { %311 = shalt.err (!%p308_p0)
}
  0x21   :  { %45 = dma.hbm_to_vmem [thread:$0]  %s393_s2, 256, %s40_s25, [#allocation6], %s339_s18, %s339_s18, %s340_s19  }
  0x22   :  { %332 = dma.done.wait [#allocation3], 32  }
  0x23   :  { %333 = vsyncadd [#allocation3], 4294967264 }
  0x24   :  { %334 = dma.done.wait [#allocation6], 512  }
  0x25   :  { %335 = vsyncadd [#allocation6], 4294966784  ;;  %v343_v0 = vmov 0.0   ;;  %vm344_vm0 = vmmov 0   ;;  %v246_v1 = vld [vmem:[#allocation5 + $0x8] sm:$0xff]   ;;  %v247_v2 = vld [vmem:[#allocation5] sm:$0xff]  }
  0x26   :  { %222 = vmatprep.subr.bf16.mxu0 %v343_v0  ;;  %226 = vmatprep.mubr.msk.bf16.mxu0 %vm344_vm0, %v343_v0  ;;  %v68_v3 = vld [vmem:[#allocation2] sm:$0x3]  ;;  %vm86_vm1 = vcmask 261120   ;;  %v249_v6 = vld [vmem:[#allocation7] sm:$0xff]   ;;  %s345_s7 = smov [#allocation8]  }
  0x27   :  { %230 = vmatprep.subr.bf16.mxu1 %v343_v0  ;;  %234 = vmatprep.mubr.msk.bf16.mxu1 %vm344_vm0, %v343_v0  ;;  %v69_v4 = vpack.c.bf16 %v68_v3, %v68_v3  ;;  %v248_v5 = vld [vmem:[#allocation7 + $0x8] sm:$0xff]   ;;  %s198_s8 = sshll.u32 %s345_s7, 4  ;;  %s199_s8 = int_to_ptr.vmem [resolvable:$true] %s198_s8 }
  0x28   :  { %223 = vmatpush3.bf16.msra.mxu0 %v246_v1  ;;  %231 = vmatpush3.bf16.msra.mxu1 %v248_v5  ;;  %v208_v7 = vld [vmem:[%s394_s3] ss:$0 sm:$0xff]  ;;  %v212_v15 = vld [vmem:[%s394_s3 + $0x1] ss:$0 sm:$0xff]  ;;  %s312_s9 = scalar_lea.vmem %s199_s8, 32  ;;  %p317_p2 = scmp.lt.s32.totalorder %s199_s8, %s199_s8 }
  0x29   :  { %224 = vmatprep.subr.bf16.mxu0 %v343_v0  ;;  %232 = vmatprep.subr.bf16.mxu1 %v343_v0  ;;  %p313_p1 = scmp.ne.s32.totalorder %s199_s8, %s312_s9  ;;  %p318_p3 = scmp.lt.s32.totalorder %s312_s9, %s312_s9 }
  0x2b   :  { %p319_p4 = por %p318_p3, %p317_p2 }
  0x2c   :  { %225 = vmatpush3.bf16.msra.mxu0 %v247_v2  ;;  %233 = vmatpush3.bf16.msra.mxu1 %v249_v6 }
  0x2d   :  { %p320_p5 = pnand %p319_p4, %p313_p1 }
  0x2f   :  { %227 = vmatmul.mubr.msk.bf16.vlgmr.msra.gmra.mxu0 %vm86_vm1, %v69_v4 }
  0xef   :  { %v124_v8 = vpop.f32.mrf.mxu0 }
  0xf0   :  { %v125_v9 = vadd.f32 %v208_v7, %v124_v8 }
  0xf1   :  { %v228_v10 = vpop.f32.mrf.mxu0 }
  0xf2   :  { %250 = vtanh.f32 %v125_v9 }
  0xf3   :  { %v127_v11 = vpop.f32.mrf.mxu0 }
  0xf5   :  { %v229_v12 = vpop.f32.mrf.mxu0 }
  0xff   :  { %v251_v13 = vpop.eup %250 }
 0x100   :  { %v131_v14 = vpack.c.bf16 %v251_v13, %v251_v13 }
 0x102   :  { %235 = vmatmul.mubr.msk.bf16.vlgmr.msra.gmra.mxu1 %vm86_vm1, %v131_v14 }
 0x1c2   :  { %v185_v16 = vpop.f32.mrf.mxu1 }
 0x1c3   :  { %v186_v17 = vadd.f32 %v212_v15, %v185_v16 }
 0x1c4   :  { %v236_v18 = vpop.f32.mrf.mxu1 }
 0x1c5   :  { %191 = vst [vmem:[#allocation8] sm:$0x3] %v186_v17 }
 0x1c6   :  { %v188_v19 = vpop.f32.mrf.mxu1 }
 0x1c7   :  { %323 = shalt.err (!%p320_p5)
}
 0x1c8   :  { %201 = dma.vmem_to_hbm [thread:$0]  %s199_s8, 32, %s395_s4, [#allocation4]   ;;  %v237_v20 = vpop.f32.mrf.mxu1 }
 0x1c9   :  { %336 = dma.done.wait [#allocation4], 32  }
 0x1ca   :  { %337 = vsyncadd [#allocation4], 4294967264 }
 0x1cb   :  { %205 = vsyncpa [#allocation3], 1 }
 0x1cc   :  { %206 = vsyncpa [#allocation6], 1 }
 0x1cd   :  { %207 = vsyncpa [#allocation4], 1 }

</bundles_post_ra>
